<compile_context>
chip_gen: v7x
topology: tpu7x:2x2x1
jax: 0.10.0
libtpu: 0.0.40
codegen_flags: <defaults>
</compile_context>

<pallas_src>
import jax
import jax.numpy as jnp
from jax import lax
from jax.experimental import pallas as pl
from jax.experimental.pallas import tpu as pltpu


def _round_up(x, m):
    return ((x + m - 1) // m) * m


def _make_hybrid_loss_kernel(seg_weight, density_weight, count_weight,
                             B, C, HW, TILE):
    seg_w = float(seg_weight)
    dens_w = float(density_weight)
    cnt_w = float(count_weight)
    n_tiles = pl.cdiv(HW, TILE)
    ragged = (HW % TILE) != 0     # compile-time: mask only when needed

    def kernel(logits_ref, tgt_ref, dpred_ref, dtgt_ref, ctgt_ref,
               out_ref, ce_acc, sq_acc, dsum_acc, cnt_ref):
        b = pl.program_id(0)
        t = pl.program_id(1)

        # ---- init global accumulators (first grid step only) ---------------
        @pl.when(jnp.logical_and(b == 0, t == 0))
        def _():
            ce_acc[...] = jnp.zeros_like(ce_acc)       # per-lane CE partials
            sq_acc[...] = jnp.zeros_like(sq_acc)       # per-lane sq-diff partials
            cnt_ref[0] = jnp.float32(0.0)              # sum_b |count_pred - count_tgt|

        # ---- init per-image density accumulator -----------------------------
        @pl.when(t == 0)
        def _():
            dsum_acc[...] = jnp.zeros_like(dsum_acc)

        if ragged:
            pos = t * TILE + lax.broadcasted_iota(jnp.int32, (1, TILE), 1)
            valid = pos < HW                            # (1, TILE)

        # ---- segmentation cross-entropy (classes on sublanes) ---------------
        x = logits_ref[...].astype(jnp.float32)         # (C, TILE)
        m = jnp.max(x, axis=0, keepdims=True)           # (1, TILE)
        lse = jnp.log(jnp.sum(jnp.exp(x - m), axis=0, keepdims=True)) + m
        cls = lax.broadcasted_iota(jnp.int32, (C, TILE), 0)
        tgt = tgt_ref[...].astype(jnp.int32)             # (1, TILE)
        picked = jnp.sum(jnp.where(cls == tgt, x, 0.0),
                         axis=0, keepdims=True)          # (1, TILE)
        ce = lse - picked
        if ragged:
            ce = jnp.where(valid, ce, 0.0)
        ce_acc[...] = ce_acc[...] + ce                   # VPU add only

        # ---- density MSE + per-image density sum -----------------------------
        dp = dpred_ref[...].astype(jnp.float32)          # (1, TILE)
        dt = dtgt_ref[...].astype(jnp.float32)           # (1, TILE)
        diff = dp - dt
        sq = diff * diff
        if ragged:
            sq = jnp.where(valid, sq, 0.0)
            dp = jnp.where(valid, dp, 0.0)
        sq_acc[...] = sq_acc[...] + sq
        dsum_acc[...] = dsum_acc[...] + dp

        # ---- per-image count L1 term (one cross-lane reduce per image) -------
        @pl.when(t == n_tiles - 1)
        def _():
            cnt_pred = jnp.sum(dsum_acc[...])
            cnt_ref[0] = cnt_ref[0] + jnp.abs(cnt_pred - ctgt_ref[b])

        # ---- epilogue: final reductions, normalize, weighted total -----------
        @pl.when(jnp.logical_and(b == B - 1, t == n_tiles - 1))
        def _():
            inv_n = jnp.float32(1.0 / (B * HW))
            seg_loss = jnp.sum(ce_acc[...]) * inv_n
            dens_loss = jnp.sum(sq_acc[...]) * inv_n
            count_loss = cnt_ref[0] * jnp.float32(1.0 / B)
            total = seg_w * seg_loss + dens_w * dens_loss + cnt_w * count_loss
            out_ref[0, 0] = total
            out_ref[0, 1] = seg_loss
            out_ref[0, 2] = dens_loss
            out_ref[0, 3] = count_loss

    return kernel


def hybrid_loss(outputs, targets, seg_weight=1.0, density_weight=1.0,
                count_weight=1.0):
    """Mirrors HybridLoss.forward.

    outputs: {'segmentation': (B,C,H,W), 'density': (B,1,H,W)}
    targets: {'seg_mask': (B,H,W) int, 'density_map': (B,H,W), 'count': (B,)}
    """
    seg_logits = outputs['segmentation']
    density_pred = outputs['density']
    seg_target = targets['seg_mask']
    density_target = targets['density_map']
    count_target = targets['count']

    B, C, H, W = seg_logits.shape
    HW = H * W

    # Layout plumbing only: free reshapes, no transpose, no one-hot, no extra
    # dtype passes over HBM (mask stays in its native integer dtype).
    logits3d = seg_logits.reshape(B, C, HW)
    if not jnp.issubdtype(seg_target.dtype, jnp.integer):
        seg_target = seg_target.astype(jnp.int32)
    tgt3d = seg_target.reshape(B, 1, HW)
    dpred3d = density_pred.reshape(B, 1, HW)
    dtgt3d = density_target.reshape(B, 1, HW)
    ctgt = count_target.reshape(B).astype(jnp.float32)

    # Tile selection: as large as possible (overhead-dominated otherwise),
    # bounded by a VMEM budget that is safe on every generation.
    per_lane_bytes = (2 * (C * logits3d.dtype.itemsize        # double-buffered inputs
                           + tgt3d.dtype.itemsize
                           + dpred3d.dtype.itemsize
                           + dtgt3d.dtype.itemsize)
                      + 3 * 4)                                 # f32 VMEM accumulators
    vmem_budget = 20 * 1024 * 1024     # fits v5e/v6e (128 MiB) and v7x (64 MiB)
    max_tile = max(128, (vmem_budget // per_lane_bytes) // 128 * 128)
    TILE = int(min(_round_up(HW, 128), 65536, max_tile))
    n_tiles = pl.cdiv(HW, TILE)

    kernel = _make_hybrid_loss_kernel(seg_weight, density_weight, count_weight,
                                      B, C, HW, TILE)

    out = pl.pallas_call(
        kernel,
        out_shape=jax.ShapeDtypeStruct((1, 4), jnp.float32),
        grid_spec=pltpu.PrefetchScalarGridSpec(
            num_scalar_prefetch=0,
            grid=(B, n_tiles),
            in_specs=[
                pl.BlockSpec((None, C, TILE), lambda b, t: (b, 0, t)),
                pl.BlockSpec((None, 1, TILE), lambda b, t: (b, 0, t)),
                pl.BlockSpec((None, 1, TILE), lambda b, t: (b, 0, t)),
                pl.BlockSpec((None, 1, TILE), lambda b, t: (b, 0, t)),
                pl.BlockSpec(memory_space=pltpu.MemorySpace.SMEM),
            ],
            out_specs=pl.BlockSpec(memory_space=pltpu.MemorySpace.SMEM),
            scratch_shapes=[
                pltpu.VMEM((1, TILE), jnp.float32),   # CE per-lane accumulator
                pltpu.VMEM((1, TILE), jnp.float32),   # squared-diff accumulator
                pltpu.VMEM((1, TILE), jnp.float32),   # per-image density accumulator
                pltpu.SMEM((1,), jnp.float32),        # sum_b |count_pred - count_tgt|
            ],
        ),
        compiler_params=pltpu.CompilerParams(
            dimension_semantics=("arbitrary", "arbitrary"),
            vmem_limit_bytes=32 * 1024 * 1024,
        ),
    )(logits3d, tgt3d, dpred3d, dtgt3d, ctgt)

    return {
        'total_loss': out[0, 0],
        'seg_loss': out[0, 1],
        'density_loss': out[0, 2],
        'count_loss': out[0, 3],
    }


def _reference(outputs, targets, seg_w=1.0, dens_w=1.0, cnt_w=1.0):
    """Pure-JAX reference matching PyTorch semantics."""
    seg_logits = outputs['segmentation'].astype(jnp.float32)
    density_pred = outputs['density'].astype(jnp.float32)
    seg_target = targets['seg_mask']
    density_target = targets['density_map'].astype(jnp.float32)
    count_target = targets['count'].astype(jnp.float32)

    logp = jax.nn.log_softmax(seg_logits, axis=1)               # (B,C,H,W)
    picked = jnp.take_along_axis(logp, seg_target[:, None], axis=1)[:, 0]
    loss_seg = -jnp.mean(picked)
    loss_density = jnp.mean((density_pred[:, 0] - density_target) ** 2)
    count_pred = jnp.sum(density_pred, axis=(2, 3))[:, 0]
    loss_count = jnp.mean(jnp.abs(count_pred - count_target))
    total = seg_w * loss_seg + dens_w * loss_density + cnt_w * loss_count
    return total, loss_seg, loss_density, loss_count


if __name__ == "__main__":
    B, C, H, W = 2, 4, 16, 16
    key = jax.random.PRNGKey(0)
    k1, k2, k3, k4, k5 = jax.random.split(key, 5)

    seg_logits = jax.random.normal(k1, (B, C, H, W), dtype=jnp.float32)
    density_pred = jax.random.uniform(k2, (B, 1, H, W), dtype=jnp.float32)
    seg_mask = jax.random.randint(k3, (B, H, W), 0, C, dtype=jnp.int32)
    density_map = jax.random.uniform(k4, (B, H, W), dtype=jnp.float32)
    count = jax.random.uniform(k5, (B,), dtype=jnp.float32) * 50.0

    outputs = {'segmentation': seg_logits, 'density': density_pred}
    targets = {'seg_mask': seg_mask, 'density_map': density_map, 'count': count}

    res = hybrid_loss(outputs, targets)
    jax.block_until_ready(res['total_loss'])

    ref_total, ref_seg, ref_dens, ref_cnt = _reference(outputs, targets)
    import numpy as np
    np.testing.assert_allclose(np.asarray(res['total_loss']), np.asarray(ref_total), rtol=1e-4, atol=1e-5)
    np.testing.assert_allclose(np.asarray(res['seg_loss']), np.asarray(ref_seg), rtol=1e-4, atol=1e-5)
    np.testing.assert_allclose(np.asarray(res['density_loss']), np.asarray(ref_dens), rtol=1e-4, atol=1e-5)
    np.testing.assert_allclose(np.asarray(res['count_loss']), np.asarray(ref_cnt), rtol=1e-4, atol=1e-5)

    print("KERNEL_OK")
</pallas_src>

<mosaic_0001>
module attributes {stable_mosaic.version = 11 : i64} {
  func.func @kernel(%arg0: i32, %arg1: i32, %arg2: memref<1x4x256xf32, #tpu.memory_space<vmem>>, %arg3: memref<1x1x256xi32, #tpu.memory_space<vmem>>, %arg4: memref<1x1x256xf32, #tpu.memory_space<vmem>>, %arg5: memref<1x1x256xf32, #tpu.memory_space<vmem>>, %arg6: memref<2xf32, #tpu.memory_space<smem>>, %arg7: memref<1x4xf32, #tpu.memory_space<smem>>, %arg8: memref<1x256xf32, #tpu.memory_space<vmem>>, %arg9: memref<1x256xf32, #tpu.memory_space<vmem>>, %arg10: memref<1x256xf32, #tpu.memory_space<vmem>>, %arg11: memref<1xf32, #tpu.memory_space<smem>>) attributes {dimension_semantics = [#tpu.dimension_semantics<arbitrary>, #tpu.dimension_semantics<arbitrary>], iteration_bounds = array<i64: 2, 1>, scalar_prefetch = 0 : i64, scratch_operands = 4 : i64, tpu.core_type = #tpu.core_type<tc>, window_params = [{transform_indices = @transform_0, window_bounds = array<i64: 1, 4, 256>}, {transform_indices = @transform_1, window_bounds = array<i64: 1, 1, 256>}, {transform_indices = @transform_2, window_bounds = array<i64: 1, 1, 256>}, {transform_indices = @transform_3, window_bounds = array<i64: 1, 1, 256>}, {transform_indices = @transform_4, window_bounds = array<i64: 2>}, {transform_indices = @transform_5, window_bounds = array<i64: 1, 4>}]} {
    %c0_i32 = arith.constant 0 : i32
    %0 = arith.cmpi eq, %arg0, %c0_i32 : i32
    %c0_i32_0 = arith.constant 0 : i32
    %1 = arith.cmpi eq, %arg1, %c0_i32_0 : i32
    %2 = arith.andi %0, %1 : i1
    %3 = arith.extui %2 : i1 to i32
    %c0_i32_1 = arith.constant 0 : i32
    %4 = arith.cmpi ne, %3, %c0_i32_1 : i32
    scf.if %4 {
      %cst_34 = arith.constant 0.000000e+00 : f32
      %52 = vector.broadcast %cst_34 : f32 to vector<1x256xf32>
      %c0_35 = arith.constant 0 : index
      %c0_36 = arith.constant 0 : index
      %53 = vector.load %arg8[%c0_35, %c0_36] : memref<1x256xf32, #tpu.memory_space<vmem>>, vector<1x256xf32>
      tpu.vector_store %arg8[%c0_35, %c0_36], %52 {strides = array<i32>} : memref<1x256xf32, #tpu.memory_space<vmem>>, vector<1x256xf32>,
      %cst_37 = arith.constant 0.000000e+00 : f32
      %54 = vector.broadcast %cst_37 : f32 to vector<1x256xf32>
      %c0_38 = arith.constant 0 : index
      %c0_39 = arith.constant 0 : index
      %55 = vector.load %arg9[%c0_38, %c0_39] : memref<1x256xf32, #tpu.memory_space<vmem>>, vector<1x256xf32>
      tpu.vector_store %arg9[%c0_38, %c0_39], %54 {strides = array<i32>} : memref<1x256xf32, #tpu.memory_space<vmem>>, vector<1x256xf32>,
      %cst_40 = arith.constant 0.000000e+00 : f32
      %c0_41 = arith.constant 0 : index
      %56 = memref.load %arg11[%c0_41] : memref<1xf32, #tpu.memory_space<smem>>
      memref.store %cst_40, %arg11[%c0_41] : memref<1xf32, #tpu.memory_space<smem>>
    } else {
    }
    %c0_i32_2 = arith.constant 0 : i32
    %5 = arith.cmpi eq, %arg1, %c0_i32_2 : i32
    %6 = arith.extui %5 : i1 to i32
    %c0_i32_3 = arith.constant 0 : i32
    %7 = arith.cmpi ne, %6, %c0_i32_3 : i32
    scf.if %7 {
      %cst_34 = arith.constant 0.000000e+00 : f32
      %52 = vector.broadcast %cst_34 : f32 to vector<1x256xf32>
      %c0_35 = arith.constant 0 : index
      %c0_36 = arith.constant 0 : index
      %53 = vector.load %arg10[%c0_35, %c0_36] : memref<1x256xf32, #tpu.memory_space<vmem>>, vector<1x256xf32>
      tpu.vector_store %arg10[%c0_35, %c0_36], %52 {strides = array<i32>} : memref<1x256xf32, #tpu.memory_space<vmem>>, vector<1x256xf32>,
    } else {
    }
    %c0 = arith.constant 0 : index
    %c0_4 = arith.constant 0 : index
    %c0_5 = arith.constant 0 : index
    %8 = vector.load %arg2[%c0, %c0_4, %c0_5] : memref<1x4x256xf32, #tpu.memory_space<vmem>>, vector<1x4x256xf32>
    %9 = vector.shape_cast %8 : vector<1x4x256xf32> to vector<4x256xf32>
    %cst = arith.constant dense<0xFF800000> : vector<256xf32>
    %10 = vector.multi_reduction <maximumf>, %9, %cst [0] : vector<4x256xf32> to vector<256xf32>
    %11 = vector.shape_cast %10 : vector<256xf32> to vector<1x256xf32>
    %12 = vector.broadcast %11 : vector<1x256xf32> to vector<4x256xf32>
    %13 = arith.subf %9, %12 : vector<4x256xf32>
    %14 = math.exp %13 : vector<4x256xf32>
    %cst_6 = arith.constant dense<0.000000e+00> : vector<256xf32>
    %15 = vector.multi_reduction <add>, %14, %cst_6 [0] : vector<4x256xf32> to vector<256xf32>
    %16 = vector.shape_cast %15 : vector<256xf32> to vector<1x256xf32>
    %17 = math.log %16 : vector<1x256xf32>
    %18 = arith.addf %17, %11 : vector<1x256xf32>
    %19 = tpu.iota {dimensions = array<i32: 0>} : vector<4x256xi32>
    %c0_7 = arith.constant 0 : index
    %c0_8 = arith.constant 0 : index
    %c0_9 = arith.constant 0 : index
    %20 = vector.load %arg3[%c0_7, %c0_8, %c0_9] : memref<1x1x256xi32, #tpu.memory_space<vmem>>, vector<1x1x256xi32>
    %21 = vector.shape_cast %20 : vector<1x1x256xi32> to vector<1x256xi32>
    %22 = vector.broadcast %21 : vector<1x256xi32> to vector<4x256xi32>
    %23 = arith.cmpi eq, %19, %22 : vector<4x256xi32>
    %cst_10 = arith.constant 0.000000e+00 : f32
    %24 = vector.broadcast %cst_10 : f32 to vector<4x256xf32>
    %25 = arith.select %23, %9, %24 : vector<4x256xi1>, vector<4x256xf32>
    %cst_11 = arith.constant dense<0.000000e+00> : vector<256xf32>
    %26 = vector.multi_reduction <add>, %25, %cst_11 [0] : vector<4x256xf32> to vector<256xf32>
    %27 = vector.shape_cast %26 : vector<256xf32> to vector<1x256xf32>
    %28 = arith.subf %18, %27 : vector<1x256xf32>
    %c0_12 = arith.constant 0 : index
    %c0_13 = arith.constant 0 : index
    %29 = vector.load %arg8[%c0_12, %c0_13] : memref<1x256xf32, #tpu.memory_space<vmem>>, vector<1x256xf32>
    %30 = arith.addf %29, %28 : vector<1x256xf32>
    %c0_14 = arith.constant 0 : index
    %c0_15 = arith.constant 0 : index
    %31 = vector.load %arg8[%c0_14, %c0_15] : memref<1x256xf32, #tpu.memory_space<vmem>>, vector<1x256xf32>
    tpu.vector_store %arg8[%c0_14, %c0_15], %30 {strides = array<i32>} : memref<1x256xf32, #tpu.memory_space<vmem>>, vector<1x256xf32>,
    %c0_16 = arith.constant 0 : index
    %c0_17 = arith.constant 0 : index
    %c0_18 = arith.constant 0 : index
    %32 = vector.load %arg4[%c0_16, %c0_17, %c0_18] : memref<1x1x256xf32, #tpu.memory_space<vmem>>, vector<1x1x256xf32>
    %33 = vector.shape_cast %32 : vector<1x1x256xf32> to vector<1x256xf32>
    %c0_19 = arith.constant 0 : index
    %c0_20 = arith.constant 0 : index
    %c0_21 = arith.constant 0 : index
    %34 = vector.load %arg5[%c0_19, %c0_20, %c0_21] : memref<1x1x256xf32, #tpu.memory_space<vmem>>, vector<1x1x256xf32>
    %35 = vector.shape_cast %34 : vector<1x1x256xf32> to vector<1x256xf32>
    %36 = arith.subf %33, %35 : vector<1x256xf32>
    %37 = arith.mulf %36, %36 : vector<1x256xf32>
    %c0_22 = arith.constant 0 : index
    %c0_23 = arith.constant 0 : index
    %38 = vector.load %arg9[%c0_22, %c0_23] : memref<1x256xf32, #tpu.memory_space<vmem>>, vector<1x256xf32>
    %39 = arith.addf %38, %37 : vector<1x256xf32>
    %c0_24 = arith.constant 0 : index
    %c0_25 = arith.constant 0 : index
    %40 = vector.load %arg9[%c0_24, %c0_25] : memref<1x256xf32, #tpu.memory_space<vmem>>, vector<1x256xf32>
    tpu.vector_store %arg9[%c0_24, %c0_25], %39 {strides = array<i32>} : memref<1x256xf32, #tpu.memory_space<vmem>>, vector<1x256xf32>,
    %c0_26 = arith.constant 0 : index
    %c0_27 = arith.constant 0 : index
    %41 = vector.load %arg10[%c0_26, %c0_27] : memref<1x256xf32, #tpu.memory_space<vmem>>, vector<1x256xf32>
    %42 = arith.addf %41, %33 : vector<1x256xf32>
    %c0_28 = arith.constant 0 : index
    %c0_29 = arith.constant 0 : index
    %43 = vector.load %arg10[%c0_28, %c0_29] : memref<1x256xf32, #tpu.memory_space<vmem>>, vector<1x256xf32>
    tpu.vector_store %arg10[%c0_28, %c0_29], %42 {strides = array<i32>} : memref<1x256xf32, #tpu.memory_space<vmem>>, vector<1x256xf32>,
    %c0_i32_30 = arith.constant 0 : i32
    %44 = arith.cmpi eq, %arg1, %c0_i32_30 : i32
    %45 = arith.extui %44 : i1 to i32
    %c0_i32_31 = arith.constant 0 : i32
    %46 = arith.cmpi ne, %45, %c0_i32_31 : i32
    scf.if %46 {
      %c0_34 = arith.constant 0 : index
      %c0_35 = arith.constant 0 : index
      %52 = vector.load %arg10[%c0_34, %c0_35] : memref<1x256xf32, #tpu.memory_space<vmem>>, vector<1x256xf32>
      %53 = vector.shape_cast %52 : vector<1x256xf32> to vector<1x1x256xf32>
      %cst_36 = arith.constant dense<0.000000e+00> : vector<1xf32>
      %54 = vector.multi_reduction <add>, %53, %cst_36 [1, 2] : vector<1x1x256xf32> to vector<1xf32>
      %55 = vector.shape_cast %54 : vector<1xf32> to vector<1x1x1xf32>
      %56 = vector.extract %55[0, 0, 0] : f32 from vector<1x1x1xf32>
      %c0_37 = arith.constant 0 : index
      %57 = memref.load %arg11[%c0_37] : memref<1xf32, #tpu.memory_space<smem>>
      %58 = arith.index_cast %arg0 : i32 to index
      %59 = memref.load %arg6[%58] : memref<2xf32, #tpu.memory_space<smem>>
      %60 = arith.subf %56, %59 : f32
      %61 = math.absf %60 : f32
      %62 = arith.addf %57, %61 : f32
      %c0_38 = arith.constant 0 : index
      %63 = memref.load %arg11[%c0_38] : memref<1xf32, #tpu.memory_space<smem>>
      memref.store %62, %arg11[%c0_38] : memref<1xf32, #tpu.memory_space<smem>>
    } else {
    }
    %c1_i32 = arith.constant 1 : i32
    %47 = arith.cmpi eq, %arg0, %c1_i32 : i32
    %c0_i32_32 = arith.constant 0 : i32
    %48 = arith.cmpi eq, %arg1, %c0_i32_32 : i32
    %49 = arith.andi %47, %48 : i1
    %50 = arith.extui %49 : i1 to i32
    %c0_i32_33 = arith.constant 0 : i32
    %51 = arith.cmpi ne, %50, %c0_i32_33 : i32
    scf.if %51 {
      %c0_34 = arith.constant 0 : index
      %c0_35 = arith.constant 0 : index
      %52 = vector.load %arg8[%c0_34, %c0_35] : memref<1x256xf32, #tpu.memory_space<vmem>>, vector<1x256xf32>
      %53 = vector.shape_cast %52 : vector<1x256xf32> to vector<1x1x256xf32>
      %cst_36 = arith.constant dense<0.000000e+00> : vector<1xf32>
      %54 = vector.multi_reduction <add>, %53, %cst_36 [1, 2] : vector<1x1x256xf32> to vector<1xf32>
      %55 = vector.shape_cast %54 : vector<1xf32> to vector<1x1x1xf32>
      %56 = vector.extract %55[0, 0, 0] : f32 from vector<1x1x1xf32>
      %cst_37 = arith.constant 0.001953125 : f32
      %57 = arith.mulf %56, %cst_37 : f32
      %c0_38 = arith.constant 0 : index
      %c0_39 = arith.constant 0 : index
      %58 = vector.load %arg9[%c0_38, %c0_39] : memref<1x256xf32, #tpu.memory_space<vmem>>, vector<1x256xf32>
      %59 = vector.shape_cast %58 : vector<1x256xf32> to vector<1x1x256xf32>
      %cst_40 = arith.constant dense<0.000000e+00> : vector<1xf32>
      %60 = vector.multi_reduction <add>, %59, %cst_40 [1, 2] : vector<1x1x256xf32> to vector<1xf32>
      %61 = vector.shape_cast %60 : vector<1xf32> to vector<1x1x1xf32>
      %62 = vector.extract %61[0, 0, 0] : f32 from vector<1x1x1xf32>
      %cst_41 = arith.constant 0.001953125 : f32
      %63 = arith.mulf %62, %cst_41 : f32
      %c0_42 = arith.constant 0 : index
      %64 = memref.load %arg11[%c0_42] : memref<1xf32, #tpu.memory_space<smem>>
      %cst_43 = arith.constant 5.000000e-01 : f32
      %65 = arith.mulf %64, %cst_43 : f32
      %cst_44 = arith.constant 1.000000e+00 : f32
      %66 = arith.mulf %cst_44, %57 : f32
      %cst_45 = arith.constant 1.000000e+00 : f32
      %67 = arith.mulf %cst_45, %63 : f32
      %68 = arith.addf %66, %67 : f32
      %cst_46 = arith.constant 1.000000e+00 : f32
      %69 = arith.mulf %cst_46, %65 : f32
      %70 = arith.addf %68, %69 : f32
      %c0_47 = arith.constant 0 : index
      %c0_48 = arith.constant 0 : index
      %71 = memref.load %arg7[%c0_47, %c0_48] : memref<1x4xf32, #tpu.memory_space<smem>>
      memref.store %70, %arg7[%c0_47, %c0_48] : memref<1x4xf32, #tpu.memory_space<smem>>
      %c0_49 = arith.constant 0 : index
      %c1 = arith.constant 1 : index
      %72 = memref.load %arg7[%c0_49, %c1] : memref<1x4xf32, #tpu.memory_space<smem>>
      memref.store %57, %arg7[%c0_49, %c1] : memref<1x4xf32, #tpu.memory_space<smem>>
      %c0_50 = arith.constant 0 : index
      %c2 = arith.constant 2 : index
      %73 = memref.load %arg7[%c0_50, %c2] : memref<1x4xf32, #tpu.memory_space<smem>>
      memref.store %63, %arg7[%c0_50, %c2] : memref<1x4xf32, #tpu.memory_space<smem>>
      %c0_51 = arith.constant 0 : index
      %c3 = arith.constant 3 : index
      %74 = memref.load %arg7[%c0_51, %c3] : memref<1x4xf32, #tpu.memory_space<smem>>
      memref.store %65, %arg7[%c0_51, %c3] : memref<1x4xf32, #tpu.memory_space<smem>>
    } else {
    }
    return
  }
  func.func @transform_0(%arg0: i32, %arg1: i32) -> (i32, i32, i32) {
    %c0_i32 = arith.constant 0 : i32
    %c0_i32_0 = arith.constant 0 : i32
    return %arg0, %c0_i32, %arg1 : i32, i32, i32
  }
  func.func @transform_1(%arg0: i32, %arg1: i32) -> (i32, i32, i32) {
    %c0_i32 = arith.constant 0 : i32
    %c0_i32_0 = arith.constant 0 : i32
    return %arg0, %c0_i32, %arg1 : i32, i32, i32
  }
  func.func @transform_2(%arg0: i32, %arg1: i32) -> (i32, i32, i32) {
    %c0_i32 = arith.constant 0 : i32
    %c0_i32_0 = arith.constant 0 : i32
    return %arg0, %c0_i32, %arg1 : i32, i32, i32
  }
  func.func @transform_3(%arg0: i32, %arg1: i32) -> (i32, i32, i32) {
    %c0_i32 = arith.constant 0 : i32
    %c0_i32_0 = arith.constant 0 : i32
    return %arg0, %c0_i32, %arg1 : i32, i32, i32
  }
  func.func @transform_4(%arg0: i32, %arg1: i32) -> i32 {
    %c0_i32 = arith.constant 0 : i32
    %c0_i32_0 = arith.constant 0 : i32
    return %c0_i32 : i32
  }
  func.func @transform_5(%arg0: i32, %arg1: i32) -> (i32, i32) {
    %c0_i32 = arith.constant 0 : i32
    %c0_i32_0 = arith.constant 0 : i32
    %c0_i32_1 = arith.constant 0 : i32
    return %c0_i32, %c0_i32_0 : i32, i32
  }
}

</mosaic_0001>

<bundles_post_ra>
// kernel: tpu_custom_call.1
= control target key start
LH: loop header
LB: loop body
LE: loop exit
PB: predicated region body
PF: predicated region fallthrough
CT: control target
= control target key end

     0   :  { %10 = vsyncpa [#allocation7], 0  ;;  %s1312_s0 = inlined_call_operand.hbm [shape: f32[2,4,256], index: 0, kind: input, shape index: {}]   ;;  %s1313_s1 = inlined_call_operand.hbm [shape: s32[2,1,256], index: 1, kind: input, shape index: {}]   ;;  %s1314_s2 = inlined_call_operand.vmem [shape: f32[2,1,256], index: 2, kind: input, shape index: {}]   ;;  %s1315_s3 = inlined_call_operand.vmem [shape: f32[2,1,256], index: 3, kind: input, shape index: {}]   ;;  %s1316_s4 = inlined_call_operand.vmem [shape: f32[2], index: 4, kind: input, shape index: {}]   ;;  %s1317_s5 = inlined_call_operand.hbm [shape: f32[1,4], index: 5, kind: output, shape index: {}]  }
   0x1   :  { %12 = vsyncpa [#allocation7 + $0x1], 0 }
   0x2   :  { %13 = vsyncpa [#allocation11], 0 }
   0x3   :  { %15 = vsyncpa [#allocation11 + $0x1], 0 }
   0x4   :  { %16 = vsyncpa [#allocation9], 0 }
   0x5   :  { %17 = vsyncpa [#allocation8], 0  ;;  %s1055_s18 = smov 0   ;;  %s1057_s19 = smov 0  }
   0x6   :  { %s1059_s20 = smov 0   ;;  %s1061_s21 = smov 0  }
   0x7   :  { %s1063_s22 = smov 0   ;;  %s1065_s23 = smov 0  }
   0x8 LB: > { %s745_s24 = sadd.s32 4294967295, %s1015_s23   ;;  %p57_p0 = scmp.ne.s32.totalorder %s999_s19, %s995_s18  ;;  %s1015_s23 = sphi %s1065_s23, %s23_s23   ;;  %s1011_s22 = sphi %s1063_s22, %s1336_s22   ;;  %s1007_s21 = sphi %s1061_s21, %s1335_s21   ;;  %s1003_s20 = sphi %s1059_s20, %s1334_s20   ;;  %s999_s19 = sphi %s1057_s19, %s1333_s19   ;;  %s995_s18 = sphi %s1055_s18, %s1332_s18  }
   0x9   : > { %p1087_p1 = scmp.eq.s32.totalorder %s745_s24, 0  ;;  %p746_p2 = scmp.ge.s32.totalorder %s1015_s23, 1 }
   0xa   : > { %p194_p3 = scmp.lt.s32.totalorder %s1015_s23, 3  ;;  %s207_s29 = sshll.u32 %s1316_s4, 4  ;;  %s208_s29 = int_to_ptr.vmem [resolvable:$true] %s207_s29 }
   0xb   : > { %s1322_s25 = scalar_select %p1087_p1, 1, 0 }
   0xc   : > { %p1095_p4 = por %p1087_p1, %p57_p0  ;;  %p1102_p5 = pnand %p746_p2, %p194_p3 }
   0xd   : > { %s35_s7 = sadd.s32 1, %s1011_s22  ;;  %s44_s8 = sadd.s32 1, %s1003_s20 }
   0xe   : > { %s1323_s26 = scalar_select %p1095_p4, 1, 0 }
   0xf   : > { %s1324_s30 = scalar_select %p1102_p5, 1, 0 }
  0x10   : > { %p789_p6 = pneg %p1102_p5  ;;  %p37_p8 = scmp.ge.s32.totalorder %s35_s7, 2 }
  0x11   : > { %s866_s9 = scalar_lea.vmem %s208_s29, 16  ;;  %p874_p13 = scmp.lt.s32.totalorder %s208_s29, %s208_s29 }
  0x12   : > { %p1110_p7 = pnand %p789_p6, %p1087_p1  ;;  %p867_p9 = scmp.ne.s32.totalorder %s208_s29, %s866_s9 }
  0x13   : > { %p875_p0 = scmp.lt.s32.totalorder %s866_s9, %s866_s9 }
  0x14   : > { %p868_p10 = pneg %p1110_p7 }
  0x15   : > { %p876_p2 = por %p875_p0, %p874_p13 }
  0x16   : > { %p869_p11 = pnand %p868_p10, %p867_p9 }
  0x18   : > { %p870_p12 = pneg %p869_p11 }
  0x1a   : > { %p877_p3 = pnand %p876_p2, %p870_p12 }
  0x1c   : > { %880 = shalt.err (!%p877_p3)
}
  0x1d   : > { %s1017_s10 = smov [#allocation12]   ;;  %s1338_s7 = smov (%p37_p8, %s35_s7), 0 }
  0x1e   : > { %792 = dma.vmem_to_smem (!%p1110_p7), %s208_s29, 16, %s1017_s10, [#allocation9]  }
  0x1f   : > { %p51_p6 = scmp.ne.s32.totalorder %s1003_s20, %s999_s19  ;;  %p52_p9 = scmp.eq.s32.totalorder %s1015_s23, 0 }
  0x20   : > { %s39_s11 = ssub.s32 %s1011_s22, %s1338_s7  ;;  %p801_p10 = scmp.lt.s32.totalorder %s1015_s23, 2 }
  0x21   : > { %p42_p11 = scmp.eq.s32.totalorder %s39_s11, 0  ;;  %p53_p12 = por %p52_p9, %p51_p6 }
  0x22   : > { %s1129_s12 = sand.u32 1, %s1003_s20   ;;  %s767_s13 = sshll.u32 %s1011_s22, 7 }
  0x23   : > { %s1133_s14 = scalar_select %p42_p11, %s1003_s20, %s44_s8  }
  0x24   : > { %s749_s15 = sshll.u32 %s1129_s12, 3  ;;  %s1139_s18 = scalar_lea.hbm %s1312_s0, %s767_s13 }
  0x25   : > { %s222_s27 = scalar_lea.vmem [#allocation6], %s749_s15  ;;  %p1141_p7 = pnand %p801_p10, %p53_p12 }
  0x26   : > { %s232_s28 = sshll.u32 %s222_s27, 4  ;;  %s752_s6 = sshll.u32 %s1129_s12, 1  ;;  %s1145_s28 = int_to_ptr.vmem [resolvable:$true] %s232_s28 }
  0x27   : > { %s219_s8 = scalar_lea.sflag [#allocation7], %s1129_s12  ;;  %s881_s9 = scalar_lea.hbm %s1139_s18, 128 }
  0x28   : > { %p882_p8 = scmp.ne.s32.totalorder %s1139_s18, %s881_s9  ;;  %p883_p13 = pneg %p1141_p7 }
  0x29   : > { %s886_s13 = scalar_lea.hbm %s1312_s0, 256  ;;  %p887_p3 = scmp.lt.u32.totalorder %s1139_s18, %s1312_s0 }
  0x2a   : > { %p884_p0 = pnand %p883_p13, %p882_p8  ;;  %p888_p6 = scmp.lt.u32.totalorder %s886_s13, %s881_s9 }
  0x2b   : > { %p890_p10 = scmp.lt.u32.totalorder %s881_s9, %s1139_s18 }
  0x2c   : > { %p885_p2 = pneg %p884_p0  ;;  %p889_p9 = por %p888_p6, %p887_p3 }
  0x2e   : > { %p891_p11 = por %p890_p10, %p889_p9 }
  0x30   : > { %p892_p12 = pnand %p891_p11, %p885_p2 }
  0x32   : > { %895 = shalt.err (!%p892_p12)
}
  0x33   : > { %s896_s17 = scalar_lea.vmem %s1145_s28, 128  ;;  %s1018_s27 = smov [#allocation6]  }
  0x34   : > { %p897_p8 = scmp.ne.s32.totalorder %s1145_s28, %s896_s17  ;;  %s901_s10 = sshll.u32 %s1018_s27, 4  ;;  %s902_s10 = int_to_ptr.vmem [resolvable:$false] %s901_s10 }
  0x35   : > { %s903_s11 = scalar_lea.vmem %s902_s10, 256  ;;  %p904_p4 = scmp.lt.s32.totalorder %s1145_s28, %s902_s10 }
  0x36   : > { %p899_p0 = pnand %p897_p8, %p883_p13  ;;  %p905_p3 = scmp.lt.s32.totalorder %s903_s11, %s896_s17 }
  0x38   : > { %p900_p1 = pneg %p899_p0  ;;  %p906_p6 = por %p905_p3, %p904_p4 }
  0x3a   : > { %p907_p9 = pnand %p906_p6, %p900_p1 }
  0x3c   : > { %910 = shalt.err (!%p907_p9)
}
  0x3d   : > { %796 = dma.hbm_to_vmem [thread:$0]  (!%p1141_p7), %s1139_s18, 128, %s1145_s28, %s219_s8  }
  0x3e   : > { %s768_s9 = sshll.u32 %s1011_s22, 5  ;;  %s243_s17 = scalar_lea.vmem [#allocation10], %s752_s6 }
  0x3f   : > { %s1178_s16 = scalar_lea.hbm %s1313_s1, %s768_s9  ;;  %s253_s27 = sshll.u32 %s243_s17, 4  ;;  %s254_s27 = int_to_ptr.vmem [resolvable:$true] %s253_s27 }
  0x40   : > { %s240_s10 = scalar_lea.sflag [#allocation11], %s1129_s12  ;;  %s911_s11 = scalar_lea.hbm %s1178_s16, 32 }
  0x41   : > { %p912_p1 = scmp.ne.s32.totalorder %s1178_s16, %s911_s11  ;;  %s916_s8 = scalar_lea.hbm %s1313_s1, 64 }
  0x42   : > { %p917_p10 = scmp.lt.u32.totalorder %s1178_s16, %s1313_s1  ;;  %p918_p11 = scmp.lt.u32.totalorder %s916_s8, %s911_s11 }
  0x43   : > { %p914_p4 = pnand %p912_p1, %p883_p13  ;;  %p920_p8 = scmp.lt.u32.totalorder %s911_s11, %s1178_s16 }
  0x44   : > { %p919_p12 = por %p918_p11, %p917_p10 }
  0x45   : > { %p915_p2 = pneg %p914_p4 }
  0x46   : > { %p921_p0 = por %p920_p8, %p919_p12 }
  0x48   : > { %p922_p3 = pnand %p921_p0, %p915_p2 }
  0x4a   : > { %925 = shalt.err (!%p922_p3)
}
  0x4b   : > { %s926_s12 = scalar_lea.vmem %s254_s27, 32  ;;  %s1019_s6 = smov [#allocation10]  }
  0x4c   : > { %p927_p6 = scmp.ne.s32.totalorder %s254_s27, %s926_s12  ;;  %s931_s15 = sshll.u32 %s1019_s6, 4  ;;  %s932_s15 = int_to_ptr.vmem [resolvable:$false] %s931_s15 }
  0x4d   : > { %s933_s17 = scalar_lea.vmem %s932_s15, 64  ;;  %p934_p4 = scmp.lt.s32.totalorder %s254_s27, %s932_s15 }
  0x4e   : > { %p929_p9 = pnand %p927_p6, %p883_p13  ;;  %p935_p5 = scmp.lt.s32.totalorder %s933_s17, %s926_s12 }
  0x50   : > { %p930_p1 = pneg %p929_p9  ;;  %p936_p10 = por %p935_p5, %p934_p4 }
  0x52   : > { %p937_p11 = pnand %p936_p10, %p930_p1 }
  0x54   : > { %940 = shalt.err (!%p937_p11)
}
  0x55   : > { %799 = dma.hbm_to_vmem [thread:$0]  (!%p1141_p7), %s1178_s16, 32, %s254_s27, %s240_s10  }
  0x56   : > { %p1327_p2 = scmp.ne.s32.totalorder %s1324_s30, 0 }
  0x57   : > { %s288_s11 = sand.u32 (!%p1327_p2), 1, %s999_s19   ;;  %p1328_p13 = scmp.ne.s32.totalorder (!%p1327_p2), %s1323_s26, 0 }
  0x58   : > { %286 = sbr.rel (%p1327_p2) target bundleno = 430 (0x1ae), region = 40  ;;  %s756_s18 = sshll.u32 (!%p1327_p2), %s288_s11, 3 }
  0x59   : > { %s289_s28 = scalar_lea.sflag (!%p1327_p2), [#allocation7], %s288_s11  ;;  %s292_s8 = scalar_lea.vmem (!%p1327_p2), [#allocation6], %s756_s18 }
  0x5f   : > { %978 = dma.done.wait (%p1328_p13), %s289_s28, 128  }
  0x60   : > { %980 = vsyncadd (%p1328_p13), %s289_s28, 4294967168  ;;  %s757_s9 = sshll.u32 %s288_s11, 1  ;;  %s298_s13 = scalar_lea.sflag [#allocation11], %s288_s11 }
  0x61   : > { %s1209_s29 = scalar_lea.vmem [#allocation10], %s757_s9 }
  0x62   : > { %982 = dma.done.wait (%p1328_p13), %s298_s13, 32  }
  0x63   : > { %984 = vsyncadd (%p1328_p13), %s298_s13, 4294967264  ;;  %p1329_p5 = scmp.ne.s32.totalorder %s1322_s25, 0 }
  0x65   : > { %986 = dma.done.wait (%p1329_p5), [#allocation9], 16  }
  0x66   : > { %988 = vsyncadd (%p1329_p5), [#allocation9], 4294967280 }
  0x67   : > { %310 = sfence }
  0x68   : > { %p352_p7 = scmp.lt.s32.totalorder %s1007_s21, 1  ;;  %p369_p12 = scmp.eq.s32.totalorder %s1007_s21, 0 }
  0x69   : > { %v375_v0 = vlaneseq (%p369_p12)  ;;  %s1020_s25 = smov (%p369_p12), 0.0   ;;  %v1021_v1 = vmov (%p369_p12), 0.0  }
  0x6a   : > { %s353_s30 = scalar_select %p352_p7, %s1007_s21, 1 }
  0x6b   : > { %374 = sbr.rel (!%p369_p12) target bundleno = 114 (0x72), region = 56  ;;  %382 = sst [smem:[#allocation5]] (%p369_p12), %s1020_s25  ;;  %vm377_vm0 = vcmp.lt.s32.totalorder (%p369_p12), %v375_v0, 256 }
  0x6c   : > { %s759_s16 = sshll.u32 %s353_s30, 1  ;;  %379 = vst.msk [vmem:[#allocation2] sm:$0x3] (%p369_p12), %vm377_vm0, %v1021_v1  ;;  %380 = vst.msk [vmem:[#allocation3] sm:$0x3] (%p369_p12), %vm377_vm0, %v1021_v1 }
  0x6d   : > { %s358_s12 = scalar_lea.vmem %s1314_s2, %s759_s16  ;;  %s367_s15 = scalar_lea.vmem %s1315_s3, %s759_s16 }
  0x72 PF: > { %v386_v2 = vlaneseq  ;;  %v391_v3 = vld [vmem:[%s292_s8] sm:$0xff]  ;;  %vm395_vm1 = vcmask 1043456   ;;  %v1022_v8 = vmov 0.0   ;;  %v497_v10 = vld [vmem:[%s367_s15] sm:$0x3]  ;;  %vm521_vm3 = vcmask 1040384  }
  0x73   : > { %v393_v4 = vcombine.high %v391_v3, %v391_v3  ;;  %v396_v5 = vsel %vm395_vm1, %v391_v3, -inf  ;;  %v496_v13 = vld [vmem:[%s358_s12] sm:$0x3]  ;;  %v500_v17 = vld [vmem:[#allocation3] sm:$0x3]  ;;  %p541_p8 = scmp.eq.s32.totalorder %s1007_s21, 1 }
  0x74   : > { %vm1229_vm2 = vcmp.lt.s32.totalorder %v386_v2, 256  ;;  %v397_v7 = vrot.slane %v396_v5, 4  ;;  %v498_v14 = vsub.f32 %v496_v13, %v497_v10  ;;  %v1240_v28 = vshrl.u32 %v386_v2, 7  ;;  %v442_v36 = vld [vmem:[%s1209_s29] sm:$0x3]  ;;  %s535_s17 = sld [smem:[#allocation12 + %s1007_s21]] }
  0x75   : > { %390 = vst.msk [vmem:[#allocation4] sm:$0x3] %vm1229_vm2, %v1022_v8  ;;  %v403_v9 = vsel %vm395_vm1, %v393_v4, -inf  ;;  %s534_s11 = sld [smem:[#allocation5]] }
  0x76   : > { %v398_v11 = vmax.f32 %v396_v5, %v397_v7  ;;  %v404_v12 = vrot.slane %v403_v9, 4  ;;  %v499_v18 = vmul.f32 %v498_v14, %v498_v14  ;;  %v1246_v31 = vsub.s32 0, %v1240_v28 }
  0x77   : > { %v1249_v32 = vsub.s32 1, %v1240_v28 }
  0x78   : > { %v399_v15 = vrot.slane %v398_v11, 2  ;;  %v405_v16 = vmax.f32 %v403_v9, %v404_v12  ;;  %v501_v21 = vadd.f32 %v500_v17, %v499_v18  ;;  %v446_v41 = vrot.slane %v442_v36, %v1246_v31 }
  0x79   : > { %v450_v43 = vrot.slane %v442_v36, %v1249_v32 }
  0x7a   : > { %v400_v19 = vmax.f32 %v398_v11, %v399_v15  ;;  %v406_v20 = vrot.slane %v405_v16, 2  ;;  %502 = vst.msk [vmem:[#allocation3] sm:$0x3] %vm1229_vm2, %v501_v21  ;;  %vm451_vm4 = vcmp.eq.s32.totalorder %v1240_v28, %v446_v41  ;;  %v1023_v11 = vmov 1966171168  }
  0x7b   : > { %vm452_vm5 = vcmp.eq.s32.totalorder %v1240_v28, %v450_v43  ;;  %v453_v44 = vsel %vm451_vm4, %v391_v3, 0.0  ;;  %v476_v12 = vunpack.c.l.s4 %v1023_v11 }
  0x7c   : > { %v401_v22 = vrot.slane %v400_v19, 1  ;;  %v407_v23 = vmax.f32 %v405_v16, %v406_v20  ;;  %v503_v24 = vld [vmem:[#allocation4] sm:$0x3]  ;;  %v454_v48 = vsel %vm452_vm5, %v393_v4, 0.0  ;;  %v455_v50 = vsel %vm395_vm1, %v453_v44, 0.0 }
  0x7d   : > { %v504_v25 = vadd.f32 %v503_v24, %v496_v13  ;;  %v462_v54 = vsel %vm395_vm1, %v454_v48, 0.0  ;;  %v456_v55 = vrot.slane %v455_v50, 4  ;;  %v477_v20 = vunpack.c.0.s8 %v476_v12 }
  0x7e   : > { %v1238_v26 = vmax.f32 %v400_v19, %v401_v22  ;;  %v408_v27 = vrot.slane %v407_v23, 1  ;;  %v463_v58 = vrot.slane %v462_v54, 4 }
  0x7f   : > { %505 = vst.msk [vmem:[#allocation4] sm:$0x3] %vm1229_vm2, %v504_v25  ;;  %v457_v61 = vadd.f32 %v456_v55, %v455_v50  ;;  %v480_v24 = vsub.s32 %v477_v20, %v1240_v28 }
  0x80   : > { %v409_v29 = vmax.f32 %v407_v23, %v408_v27  ;;  %v464_v0 = vadd.f32 %v463_v58, %v462_v54 }
  0x81   : > { %v572_v28 = vld [vmem:[#allocation3] sm:$0x3] (%p541_p8) }
  0x82   : > { %v412_v30 = vcombine.low %v1238_v26, %v409_v29  ;;  %v465_v5 = vrot.slane %v464_v0, 2  ;;  %v581_v43 = vrot.slane (%p541_p8), %v572_v28, %v1249_v32 }
  0x84   : > { %v414_v33 = vsub.f32 %v391_v3, %v412_v30  ;;  %v458_v3 = vrot.slane %v457_v61, 2  ;;  %v466_v8 = vadd.f32 %v465_v5, %v464_v0  ;;  %v471_v30 = vld [vmem:[#allocation2] sm:$0x3] }
  0x86   : > { %v415_v34 = vmul.f32 1.442695, %v414_v33  ;;  %v509_v35 = vld [vmem:[#allocation4] sm:$0x3]  ;;  %v459_v7 = vadd.f32 %v458_v3, %v457_v61  ;;  %v467_v10 = vrot.slane %v466_v8, 1 }
  0x87   : > { %v514_v37 = vrot.slane %v509_v35, %v1246_v31  ;;  %v518_v38 = vrot.slane %v509_v35, %v1249_v32 }
  0x88   : > { %860 = vpow2.f32 %v415_v34  ;;  %v460_v9 = vrot.slane %v459_v7, 1  ;;  %v468_v19 = vadd.f32 %v467_v10, %v466_v8 }
  0x89   : > { %v522_v39 = vsel %vm521_vm3, %v514_v37, 0.0  ;;  %v523_v40 = vsel %vm521_vm3, %v518_v38, 0.0 }
  0x8a   : > { %v524_v42 = vadd.f32 %v523_v40, %v522_v39  ;;  %v461_v15 = vadd.f32 %v460_v9, %v459_v7 }
  0x8c   : > { %525 = vadd.xlane.f32.xlu0 %v524_v42  ;;  %v577_v42 = vrot.slane (%p541_p8), %v572_v28, %v1246_v31 }
  0x92   : > { %v861_v45 = vpop.eup %860 }
  0x93   : > { %v418_v46 = vcombine.high %v861_v45, %v861_v45  ;;  %v420_v47 = vsel %vm395_vm1, %v861_v45, 0.0 }
  0x94   : > { %v421_v49 = vrot.slane %v420_v47, 4 }
  0x95   : > { %v427_v51 = vsel %vm395_vm1, %v418_v46, 0.0  ;;  %v584_v46 = vsel (%p541_p8), %vm521_vm3, %v577_v42, 0.0 }
  0x96   : > { %v422_v52 = vadd.f32 %v421_v49, %v420_v47  ;;  %v428_v53 = vrot.slane %v427_v51, 4  ;;  %v585_v47 = vsel (%p541_p8), %vm521_vm3, %v581_v43, 0.0 }
  0x97   : > { %v586_v49 = vadd.f32 (%p541_p8), %v585_v47, %v584_v46 }
  0x98   : > { %v423_v56 = vrot.slane %v422_v52, 2  ;;  %v429_v57 = vadd.f32 %v428_v53, %v427_v51 }
  0x9a   : > { %v424_v59 = vadd.f32 %v423_v56, %v422_v52  ;;  %v430_v60 = vrot.slane %v429_v57, 2 }
  0x9c   : > { %v425_v62 = vrot.slane %v424_v59, 1  ;;  %v431_v63 = vadd.f32 %v430_v60, %v429_v57 }
  0x9e   : > { %v426_v1 = vadd.f32 %v425_v62, %v424_v59  ;;  %v432_v2 = vrot.slane %v431_v63, 1 }
  0xa0   : > { %v433_v4 = vadd.f32 %v432_v2, %v431_v63  ;;  %862 = vlog2.f32 %v426_v1 }
  0xa2   : > { %864 = vlog2.f32 %v433_v4 }
  0xaa   : > { %v863_v13 = vpop.eup %862 }
  0xab   : > { %v435_v14 = vmul.f32 0.6931472, %v863_v13 }
  0xac   : > { %v865_v16 = vpop.eup %864 }
  0xad   : > { %v437_v17 = vmul.f32 0.6931472, %v865_v16  ;;  %v438_v18 = vadd.f32 %v435_v14, %v1238_v26 }
  0xaf   : > { %v439_v21 = vadd.f32 %v437_v17, %v409_v29  ;;  %v469_v22 = vsub.f32 %v438_v18, %v461_v15 }
  0xb1   : > { %v470_v23 = vsub.f32 %v439_v21, %v468_v19 }
  0xb3   : > { %v474_v25 = vcombine.low %v469_v22, %v470_v23 }
  0xb5   : > { %v481_v27 = vrot.slane %v474_v25, %v480_v24 }
  0xb7   : > { %v488_v33 = vrot.slane %v481_v27, %v480_v24 }
  0xb9   : > { %v490_v34 = vadd.f32 %v488_v33, %v471_v30 }
  0xbb   : > { %495 = vst.msk [vmem:[#allocation2] sm:$0x3] %vm1229_vm2, %v490_v34 }
  0xc2   : > { %v546_v6 = vld [vmem:[#allocation2] sm:$0x3] (%p541_p8) }
  0xc3   : > { %v551_v40 = vrot.slane (%p541_p8), %v546_v6, %v1246_v31  ;;  %v555_v41 = vrot.slane (%p541_p8), %v546_v6, %v1249_v32 }
  0xc5   : > { %v559_v44 = vsel (%p541_p8), %vm521_vm3, %v551_v40, 0.0  ;;  %v560_v45 = vsel (%p541_p8), %vm521_vm3, %v555_v41, 0.0 }
  0xc6   : > { %v561_v48 = vadd.f32 (%p541_p8), %v560_v45, %v559_v44 }
  0xc8   : > { %562 = vadd.xlane.f32.xlu0 (%p541_p8), %v561_v48 }
  0xcc   : > { %587 = vadd.xlane.f32.xlu0 (%p541_p8), %v586_v49 }
 0x119   : > { %v526_v35 = vpop.xlane.xlu0 %525 }
 0x11a   : > { %v527_v36 = vrot.slane %v526_v35, 4 }
 0x11c   : > { %v528_v26 = vadd.f32 %v527_v36, %v526_v35 }
 0x11e   : > { %v529_v37 = vrot.slane %v528_v26, 2 }
 0x120   : > { %v530_v38 = vadd.f32 %v529_v37, %v528_v26 }
 0x122   : > { %v531_v29 = vrot.slane %v530_v38, 1 }
 0x124   : > { %v532_v39 = vadd.f32 %v531_v29, %v530_v38 }
 0x126   : > { %771 = vpush %v532_v39 }
 0x155   : > { %v563_v50 = vpop.xlane.xlu0 (%p541_p8), %562 }
 0x156   : > { %v564_v51 = vrot.slane (%p541_p8), %v563_v50, 4 }
 0x157   : > { %s772_s18 = spop %771  ;;  %545 = sbr.rel (!%p541_p8) target bundleno = 415 (0x19f), region = 68 }
 0x158   : > { %s536_s28 = ssub.f32 %s772_s18, %s535_s17  ;;  %v565_v31 = vadd.f32 (%p541_p8), %v564_v51, %v563_v50 }
 0x159   : > { %v588_v52 = vpop.xlane.xlu0 (%p541_p8), %587 }
 0x15a   : > { %s537_s8 = sand.u32 2147483647, %s536_s28  ;;  %v566_v32 = vrot.slane (%p541_p8), %v565_v31, 2  ;;  %v589_v53 = vrot.slane (%p541_p8), %v588_v52, 4 }
 0x15b   : > { %s538_s9 = sadd.f32 %s537_s8, %s534_s11 }
 0x15c   : > { %v590_v54 = vadd.f32 (%p541_p8), %v589_v53, %v588_v52  ;;  %v567_v55 = vadd.f32 (%p541_p8), %v566_v32, %v565_v31 }
 0x15d   : > { %540 = sst [smem:[#allocation5]] %s538_s9 }
 0x15e   : > { %s597_s21 = sld [smem:[#allocation5]]  ;;  %v591_v56 = vrot.slane %v590_v54, 2  ;;  %v568_v57 = vrot.slane %v567_v55, 1 }
 0x160   : > { %v592_v58 = vadd.f32 %v591_v56, %v590_v54  ;;  %v569_v59 = vadd.f32 %v568_v57, %v567_v55 }
 0x162   : > { %773 = vpush %v569_v59  ;;  %v593_v60 = vrot.slane %v592_v58, 1 }
 0x164   : > { %s598_s13 = smul.f32 0.5, %s597_s21  ;;  %v594_v61 = vadd.f32 %v593_v60, %v592_v58 }
 0x166   : > { %608 = sst [smem:[#allocation13 + $0x3]] %s598_s13  ;;  %775 = vpush %v594_v61 }
 0x193   : > { %s774_s29 = spop %773 }
 0x194   : > { %s571_s30 = smul.f32 0.001953125, %s774_s29 }
 0x196   : > { %604 = sst [smem:[#allocation13 + $0x1]] %s571_s30 }
 0x197   : > { %s776_s16 = spop %775 }
 0x198   : > { %s596_s27 = smul.f32 0.001953125, %s776_s16 }
 0x19a   : > { %s599_s10 = sadd.f32 %s596_s27, %s571_s30 }
 0x19b   : > { %606 = sst [smem:[#allocation13 + $0x2]] %s596_s27 }
 0x19c   : > { %s600_s12 = sadd.f32 %s599_s10, %s598_s13 }
 0x19e   : > { %602 = sst [smem:[#allocation13]] %s600_s12 }
 0x19f PF: > { %p803_p0 = scmp.eq.s32.totalorder %s745_s24, 1  ;;  %s941_s15 = scalar_lea.hbm %s1317_s5, 16 }
 0x1a0   : > { %p942_p3 = scmp.ne.s32.totalorder %s1317_s5, %s941_s15  ;;  %p947_p1 = scmp.lt.u32.totalorder %s941_s15, %s1317_s5 }
 0x1a2   : > { %p943_p6 = pnand %p942_p3, %p803_p0 }
 0x1a4   : > { %p944_p9 = pneg %p943_p6 }
 0x1a6   : > { %p949_p4 = pnand %p947_p1, %p944_p9 }
 0x1a8   : > { %952 = shalt.err (!%p949_p4)
}
 0x1a9   : > { %s1024_s28 = smov [#allocation13]  }
 0x1aa   : > { %786 = dma.smem_to_hbm (%p803_p0), %s1024_s28, 16, %s1317_s5, [#allocation8]  }
 0x1ab   : > { %990 = dma.done.wait (%p803_p0), [#allocation8], 16  }
 0x1ac   : > { %992 = vsyncadd (%p803_p0), [#allocation8], 4294967280 }
 0x1ad   : > { %622 = sfence }
 0x1ae PF: > { %s23_s23 = sadd.s32 1, %s1015_s23   ;;  %s1332_s18 = smov %s999_s19 }
 0x1af   : > { %p20_p10 = scmp.ge.s32.totalorder %s23_s23, 4   ;;  %s1333_s19 = smov %s1003_s20 }
 0x1b0   : > { %s1334_s20 = smov %s1133_s14  ;;  %s1335_s21 = smov %s1011_s22 }
 0x1b1   : > { %s1336_s22 = smov %s1338_s7  ;;  %22 = sbr.rel (!%p20_p10) target bundleno = 8 (0x8), region = 123 }
 0x1b8   :  { %628 = vsyncpa [#allocation7], 1 }
 0x1b9   :  { %630 = vsyncpa [#allocation7 + $0x1], 1 }
 0x1ba   :  { %631 = vsyncpa [#allocation11], 1 }
 0x1bb   :  { %633 = vsyncpa [#allocation11 + $0x1], 1 }
 0x1bc   :  { %634 = vsyncpa [#allocation8], 1 }
 0x1bd   :  { %636 = vsyncpa [#allocation8 + $0x1], 1 }
 0x1be   :  { %637 = vsyncpa [#allocation9], 1 }
 0x1bf   :  { %639 = vsyncpa [#allocation9 + $0x1], 1 }

</bundles_post_ra>
